<compile_context>
chip_gen: v6e
topology: v6e:2x2x1
jax: 0.10.0
libtpu: 0.0.40
codegen_flags: <defaults>
</compile_context>

<pallas_src>
import functools

import jax
import jax.numpy as jnp
from jax.experimental import pallas as pl
from jax.experimental.pallas import tpu as pltpu


def image_encoder_kernel(patches_ref, convw_ref, fcw_ref, fcb_ref, out_ref,
                         *, normalise_out: bool):
    """One grid step == one batch tile of TB images.

    patches_ref : [TB, HW, CK]  im2col patches of this batch tile (bf16 or f32)
    convw_ref   : [CK, F]       stand-in backbone conv weight (pre-transposed)
    fcw_ref     : [F, EP]       fc weight, pre-transposed + lane-padded to EP
    fcb_ref     : [1, EP]       fc bias (zero-padded), f32
    out_ref     : [TB, EP]      embeddings for this batch tile (lane-dense)
    """
    TB, HW, CK = patches_ref.shape
    F = convw_ref.shape[1]

    # ---- stand-in backbone: conv as ONE [TB*HW, CK]x[CK, F] matmul (MXU) ----
    p2 = patches_ref[...].reshape(TB * HW, CK)
    conv = jnp.dot(p2, convw_ref[...],
                   preferred_element_type=jnp.float32)           # [TB*HW, F]
    conv = jnp.maximum(conv, 0.0)                                # ReLU (VPU)
    # GAP as a sum: the 1/HW factor is cancelled exactly by the unconditional
    # feature L2 normalisation below, so the per-element scale would be wasted
    # VPU work.
    feat = jnp.sum(conv.reshape(TB, HW, F), axis=1)              # [TB, F]

    # ---- normalise(features): A * rsqrt(sum(A^2, dim=1, keepdim)) ----
    # (torch semantics: no epsilon; rsqrt runs on the EUP, no divide.
    #  NOTE: all-zero pooled features would give inf/NaN, same as torch.)
    feat = feat * jax.lax.rsqrt(jnp.sum(feat * feat, axis=1, keepdims=True))

    # ---- fc: Linear(in_feat, embedding_dim), y = x @ W^T + b ----
    emb = jnp.dot(feat.astype(fcw_ref.dtype), fcw_ref[...],
                  preferred_element_type=jnp.float32)            # [TB, EP] (MXU)
    emb = emb + fcb_ref[...]

    # ---- optional final normalise (padded lanes are exactly 0 -> no effect) --
    if normalise_out:
        emb = emb * jax.lax.rsqrt(jnp.sum(emb * emb, axis=1, keepdims=True))

    out_ref[...] = emb.astype(out_ref.dtype)     # single lane-dense store


def image_encoder_forward(images, conv_w, fc_w, fc_b, *, normalise_out=True,
                          batch_tile=8, use_bf16=True):
    """images: [B, C, H, W] (NCHW).  Returns embeddings [B, E]."""
    B, C, H, W = images.shape
    F, _, KH, KW = conv_w.shape
    E = fc_w.shape[0]
    HW, CK = H * W, KH * KW * C
    in_dtype = jnp.bfloat16 if use_bf16 else jnp.float32

    # Lane-dense output slab: pad E up to a multiple of 128.
    EP = pl.cdiv(E, 128) * 128

    # Batch tiling: whole batch in one step when small; otherwise TB per step.
    TB = min(B, batch_tile)
    B_pad = pl.cdiv(B, TB) * TB

    # -------- plain-JAX glue: 'same' pad + im2col (odd KH/KW assumed) --------
    # TODO(synk): at real-backbone sizes do NOT materialise ~KH*KW x the image
    # bytes as im2col in HBM; accumulate KH*KW shifted-view matmuls inside the
    # kernel (padded image DMA'd once), tile the HW reduction with a resident
    # [TB, F] accumulator (pl.when init/finalize) and set vmem_limit_bytes
    # explicitly (v7x has only 64 MiB VMEM).  At these stand-in sizes the extra
    # traffic is noise.
    ph, pw = KH // 2, KW // 2
    x_pad = jnp.pad(images, ((0, 0), (0, 0), (ph, ph), (pw, pw)))
    views = [x_pad[:, :, kh:kh + H, kw:kw + W]
             for kh in range(KH) for kw in range(KW)]            # each [B, C, H, W]
    patches = jnp.stack(views, axis=1)                           # [B, KH*KW, C, H, W]
    patches = jnp.transpose(patches, (0, 3, 4, 1, 2))            # [B, H, W, KH*KW, C]
    patches = patches.reshape(B, HW, CK).astype(in_dtype)        # [B, HW, CK]
    if B_pad != B:
        # Padded (all-zero) images produce NaN rows (rsqrt(0)); they are sliced
        # off below and never contaminate real rows (all math is row-local).
        patches = jnp.pad(patches, ((0, B_pad - B), (0, 0), (0, 0)))

    # conv weight [F, C, KH, KW] -> [KH*KW*C, F] to match the patch CK ordering.
    convw_t = jnp.transpose(conv_w, (2, 3, 1, 0)).reshape(CK, F).astype(in_dtype)
    # fc weight [E, F] -> [F, EP] (pre-transposed + zero-padded lanes).
    fcw_t = jnp.transpose(fc_w, (1, 0)).astype(in_dtype)
    fcw_t = jnp.pad(fcw_t, ((0, 0), (0, EP - E)))
    fcb2 = jnp.pad(fc_b.reshape(1, E).astype(jnp.float32), ((0, 0), (0, EP - E)))

    kernel = functools.partial(image_encoder_kernel, normalise_out=normalise_out)

    # NOTE: convw/fcw/fcb are grid-invariant; at real backbone weight sizes mark
    # them pipeline_mode=pl.Buffered(1) to avoid double-buffering the resident
    # weights in VMEM (critical on v7x's 64 MiB).  At these sizes (grid length 1
    # for the demo) it changes nothing, so it is left at the default.
    out = pl.pallas_call(
        kernel,
        out_shape=jax.ShapeDtypeStruct((B_pad, EP), jnp.float32),
        grid=(B_pad // TB,),
        in_specs=[
            pl.BlockSpec((TB, HW, CK), lambda b: (b, 0, 0)),  # batch tile of patches
            pl.BlockSpec((CK, F),      lambda b: (0, 0)),     # conv weight (resident)
            pl.BlockSpec((F, EP),      lambda b: (0, 0)),     # fc weight (resident)
            pl.BlockSpec((1, EP),      lambda b: (0, 0)),     # fc bias (resident)
        ],
        out_specs=pl.BlockSpec((TB, EP), lambda b: (b, 0)),
        compiler_params=pltpu.CompilerParams(
            dimension_semantics=("parallel",)),  # v7x: shards only if >=2 chunky steps
    )(patches, convw_t, fcw_t, fcb2)

    return out[:B, :E]


def _reference_forward(images, conv_w, fc_w, fc_b, *, normalise_out=True):
    """Pure-JAX f32 reference mirroring the PyTorch semantics."""
    conv = jax.lax.conv_general_dilated(
        images.astype(jnp.float32), conv_w.astype(jnp.float32),
        window_strides=(1, 1), padding="SAME",
        dimension_numbers=("NCHW", "OIHW", "NCHW"))
    feat = jnp.mean(jnp.maximum(conv, 0.0), axis=(2, 3))           # [B, F]
    feat = feat / jnp.sqrt(jnp.sum(feat ** 2, axis=1, keepdims=True))
    emb = feat @ fc_w.astype(jnp.float32).T + fc_b.astype(jnp.float32)
    if normalise_out:
        emb = emb / jnp.sqrt(jnp.sum(emb ** 2, axis=1, keepdims=True))
    return emb


if __name__ == "__main__":
    # Small shapes consistent with the module's forward.
    B, C, H, W = 2, 4, 16, 16      # images
    IN_FEAT = 64                   # stand-in backbone feature width ("in_feat")
    EMB_DIM = 32                   # embedding_dim
    NORMALISE = True               # module's `normalise` flag

    key = jax.random.PRNGKey(0)
    k_img, k_conv, k_fc = jax.random.split(key, 3)

    images = jax.random.normal(k_img, (B, C, H, W), dtype=jnp.float32)

    # Deterministic parameter init (synthetic; no checkpoint load).
    conv_w = 0.1 * jax.random.normal(k_conv, (IN_FEAT, C, 3, 3), dtype=jnp.float32)
    # Xavier-style uniform init for fc, matching init_weights(): r = sqrt(6)/sqrt(in+out)
    r = jnp.sqrt(6.0) / jnp.sqrt(float(IN_FEAT + EMB_DIM))
    fc_w = jax.random.uniform(k_fc, (EMB_DIM, IN_FEAT), minval=-r, maxval=r,
                              dtype=jnp.float32)
    fc_b = jnp.zeros((EMB_DIM,), dtype=jnp.float32)

    ref = _reference_forward(images, conv_w, fc_w, fc_b, normalise_out=NORMALISE)

    # bf16 MXU path (default): f32 accumulation, relaxed tolerance vs f32 ref.
    out_bf16 = image_encoder_forward(images, conv_w, fc_w, fc_b,
                                     normalise_out=NORMALISE, use_bf16=True)
    out_bf16 = jax.block_until_ready(out_bf16)
    if not jnp.allclose(out_bf16, ref, atol=2e-2, rtol=2e-2):
        raise AssertionError("Pallas kernel (bf16) output mismatch vs. JAX reference")

    # Exact f32 path (flag) for tight comparison against the torch-style reference.
    out_f32 = image_encoder_forward(images, conv_w, fc_w, fc_b,
                                    normalise_out=NORMALISE, use_bf16=False)
    out_f32 = jax.block_until_ready(out_f32)
    if not jnp.allclose(out_f32, ref, atol=1e-4, rtol=1e-4):
        raise AssertionError("Pallas kernel (f32) output mismatch vs. JAX reference")

    print("KERNEL_OK")
</pallas_src>

<mosaic_0001>
module attributes {stable_mosaic.version = 11 : i64} {
  func.func @image_encoder_kernel(%arg0: i32, %arg1: memref<2x256x36xbf16, #tpu.memory_space<vmem>>, %arg2: memref<36x64xbf16, #tpu.memory_space<vmem>>, %arg3: memref<64x128xbf16, #tpu.memory_space<vmem>>, %arg4: memref<1x128xf32, #tpu.memory_space<vmem>>, %arg5: memref<2x128xf32, #tpu.memory_space<vmem>>) attributes {dimension_semantics = [#tpu.dimension_semantics<parallel>], iteration_bounds = array<i64: 1>, scalar_prefetch = 0 : i64, scratch_operands = 0 : i64, tpu.core_type = #tpu.core_type<tc>, window_params = [{transform_indices = @transform_0, window_bounds = array<i64: 2, 256, 36>}, {pipeline_mode = #tpu.pipeline_mode<synchronous>, transform_indices = @transform_1, window_bounds = array<i64: 36, 64>}, {pipeline_mode = #tpu.pipeline_mode<synchronous>, transform_indices = @transform_2, window_bounds = array<i64: 64, 128>}, {pipeline_mode = #tpu.pipeline_mode<synchronous>, transform_indices = @transform_3, window_bounds = array<i64: 1, 128>}, {transform_indices = @transform_4, window_bounds = array<i64: 2, 128>}]} {
    %c0 = arith.constant 0 : index
    %c0_0 = arith.constant 0 : index
    %c0_1 = arith.constant 0 : index
    %0 = vector.load %arg1[%c0, %c0_0, %c0_1] : memref<2x256x36xbf16, #tpu.memory_space<vmem>>, vector<2x256x36xbf16>
    %1 = vector.shape_cast %0 : vector<2x256x36xbf16> to vector<512x36xbf16>
    %c0_2 = arith.constant 0 : index
    %c0_3 = arith.constant 0 : index
    %2 = vector.load %arg2[%c0_2, %c0_3] : memref<36x64xbf16, #tpu.memory_space<vmem>>, vector<36x64xbf16>
    %cst = arith.constant dense<0.000000e+00> : vector<512x64xf32>
    %3 = tpu.matmul %1, %2, %cst {dimension_numbers = #tpu.dot_dimension_numbers<[1], [0], [0], [1], [0, 0, 1, 1], [], []>} : vector<512x36xbf16>, vector<36x64xbf16>, vector<512x64xf32> -> vector<512x64xf32>
    %cst_4 = arith.constant 0.000000e+00 : f32
    %4 = vector.broadcast %cst_4 : f32 to vector<512x64xf32>
    %5 = arith.maximumf %3, %4 : vector<512x64xf32>
    %6 = vector.shape_cast %5 : vector<512x64xf32> to vector<2x256x64xf32>
    %cst_5 = arith.constant dense<0.000000e+00> : vector<2x64xf32>
    %7 = vector.multi_reduction <add>, %6, %cst_5 [1] : vector<2x256x64xf32> to vector<2x64xf32>
    %8 = arith.mulf %7, %7 : vector<2x64xf32>
    %cst_6 = arith.constant dense<0.000000e+00> : vector<2xf32>
    %9 = vector.multi_reduction <add>, %8, %cst_6 [1] : vector<2x64xf32> to vector<2xf32>
    %10 = vector.shape_cast %9 : vector<2xf32> to vector<2x1xf32>
    %11 = math.rsqrt %10 : vector<2x1xf32>
    %12 = vector.broadcast %11 : vector<2x1xf32> to vector<2x64xf32>
    %13 = arith.mulf %7, %12 : vector<2x64xf32>
    %14 = arith.truncf %13 : vector<2x64xf32> to vector<2x64xbf16>
    %c0_7 = arith.constant 0 : index
    %c0_8 = arith.constant 0 : index
    %15 = vector.load %arg3[%c0_7, %c0_8] : memref<64x128xbf16, #tpu.memory_space<vmem>>, vector<64x128xbf16>
    %cst_9 = arith.constant dense<0.000000e+00> : vector<2x128xf32>
    %16 = tpu.matmul %14, %15, %cst_9 {dimension_numbers = #tpu.dot_dimension_numbers<[1], [0], [0], [1], [0, 0, 1, 1], [], []>} : vector<2x64xbf16>, vector<64x128xbf16>, vector<2x128xf32> -> vector<2x128xf32>
    %c0_10 = arith.constant 0 : index
    %c0_11 = arith.constant 0 : index
    %17 = vector.load %arg4[%c0_10, %c0_11] : memref<1x128xf32, #tpu.memory_space<vmem>>, vector<1x128xf32>
    %18 = vector.broadcast %17 : vector<1x128xf32> to vector<2x128xf32>
    %19 = arith.addf %16, %18 : vector<2x128xf32>
    %20 = arith.mulf %19, %19 : vector<2x128xf32>
    %cst_12 = arith.constant dense<0.000000e+00> : vector<2xf32>
    %21 = vector.multi_reduction <add>, %20, %cst_12 [1] : vector<2x128xf32> to vector<2xf32>
    %22 = vector.shape_cast %21 : vector<2xf32> to vector<2x1xf32>
    %23 = math.rsqrt %22 : vector<2x1xf32>
    %24 = vector.broadcast %23 : vector<2x1xf32> to vector<2x128xf32>
    %25 = arith.mulf %19, %24 : vector<2x128xf32>
    %c0_13 = arith.constant 0 : index
    %c0_14 = arith.constant 0 : index
    %26 = vector.load %arg5[%c0_13, %c0_14] : memref<2x128xf32, #tpu.memory_space<vmem>>, vector<2x128xf32>
    tpu.vector_store %arg5[%c0_13, %c0_14], %25 {strides = array<i32>} : memref<2x128xf32, #tpu.memory_space<vmem>>, vector<2x128xf32>,
    return
  }
  func.func @transform_0(%arg0: i32) -> (i32, i32, i32) {
    %c0_i32 = arith.constant 0 : i32
    %c0_i32_0 = arith.constant 0 : i32
    %c0_i32_1 = arith.constant 0 : i32
    return %arg0, %c0_i32, %c0_i32_0 : i32, i32, i32
  }
  func.func @transform_1(%arg0: i32) -> (i32, i32) {
    %c0_i32 = arith.constant 0 : i32
    %c0_i32_0 = arith.constant 0 : i32
    %c0_i32_1 = arith.constant 0 : i32
    return %c0_i32, %c0_i32_0 : i32, i32
  }
  func.func @transform_2(%arg0: i32) -> (i32, i32) {
    %c0_i32 = arith.constant 0 : i32
    %c0_i32_0 = arith.constant 0 : i32
    %c0_i32_1 = arith.constant 0 : i32
    return %c0_i32, %c0_i32_0 : i32, i32
  }
  func.func @transform_3(%arg0: i32) -> (i32, i32) {
    %c0_i32 = arith.constant 0 : i32
    %c0_i32_0 = arith.constant 0 : i32
    %c0_i32_1 = arith.constant 0 : i32
    return %c0_i32, %c0_i32_0 : i32, i32
  }
  func.func @transform_4(%arg0: i32) -> (i32, i32) {
    %c0_i32 = arith.constant 0 : i32
    %c0_i32_0 = arith.constant 0 : i32
    return %arg0, %c0_i32 : i32, i32
  }
}

</mosaic_0001>

<bundles_post_ra>
// kernel: tpu_custom_call.1
= control target key start
LH: loop header
LB: loop body
LE: loop exit
PB: predicated region body
PF: predicated region fallthrough
CT: control target
= control target key end

     0   :  { %vm360_vm0 = vcmask 1041408   ;;  %vm263_vm1 = vcmask 293888   ;;  %s1568_s0 = inlined_call_operand.vmem [shape: bf16[2,256,36], index: 0, kind: input, shape index: {}]   ;;  %s1569_s1 = inlined_call_operand.vmem [shape: bf16[36,64], index: 1, kind: input, shape index: {}]   ;;  %s1570_s2 = inlined_call_operand.vmem [shape: bf16[64,128], index: 2, kind: input, shape index: {}]   ;;  %s1571_s3 = inlined_call_operand.vmem [shape: f32[1,128], index: 3, kind: input, shape index: {}]   ;;  %s1572_s4 = inlined_call_operand.hbm [shape: f32[2,128], index: 4, kind: output, shape index: {}]  }
   0x1   :  { %v1192_v0 = vld [vmem:[%s1569_s1 + $0x10] ss:$0 sps:$4 sm:$0x33]   ;;  %v1193_v1 = vld [vmem:[%s1569_s1 + $0x8] sm:$0xff]   ;;  %v1195_v3 = vld [vmem:[%s1568_s0] sm:$0xff]  }
   0x2   :  { %1187 = vmatprep.subr.msk.bf16.mxu0 %vm360_vm0, %v1192_v0  ;;  %v362_v2 = vsel %vm360_vm0, %v1192_v0, 0  ;;  %1188 = vmatprep.subr.msk.bf16.mxu1 %vm360_vm0, %v1192_v0  ;;  %v1194_v4 = vld [vmem:[%s1569_s1] sm:$0xff]   ;;  %v1196_v5 = vld [vmem:[%s1568_s0 + $0x8] sm:$0xff]   ;;  %v1197_v6 = vld [vmem:[%s1568_s0 + $0x10] sm:$0xff]  }
   0x3   :  { %1100 = vmatpush3.bf16.msra.mxu0 %v362_v2  ;;  %1184 = vmatpush3.bf16.msra.mxu1 %v362_v2  ;;  %v1198_v7 = vld [vmem:[%s1568_s0 + $0x18] sm:$0xff]   ;;  %v1199_v8 = vld [vmem:[%s1568_s0 + $0x20] sm:$0xff]   ;;  %v1213_v9 = vld [vmem:[%s1568_s0 + $0x90] sm:$0xff]  }
   0x4   :  { %1101 = vmatprep.subr.bf16.mxu0 %v1193_v1  ;;  %1182 = vmatprep.subr.bf16.mxu1 %v1193_v1  ;;  %v1214_v10 = vld [vmem:[%s1568_s0 + $0x98] sm:$0xff]   ;;  %v1215_v11 = vld [vmem:[%s1568_s0 + $0xa0] sm:$0xff]   ;;  %v1200_v12 = vld [vmem:[%s1568_s0 + $0x28] sm:$0xff]  }
   0x5   :  { %1105 = vmatprep.mubr.msk.bf16.mxu0 %vm263_vm1, %v1195_v3  ;;  %1141 = vmatprep.mubr.msk.bf16.mxu1 %vm263_vm1, %v1213_v9  ;;  %v1201_v13 = vld [vmem:[%s1568_s0 + $0x30] sm:$0xff]   ;;  %v1216_v14 = vld [vmem:[%s1568_s0 + $0xa8] sm:$0xff]   ;;  %v1202_v16 = vld [vmem:[%s1568_s0 + $0x38] sm:$0xff]  }
   0x6   :  { %v1217_v15 = vld [vmem:[%s1568_s0 + $0xb0] sm:$0xff]   ;;  %v1203_v17 = vld [vmem:[%s1568_s0 + $0x40] sm:$0xff]   ;;  %v1218_v18 = vld [vmem:[%s1568_s0 + $0xb8] sm:$0xff]  }
   0x7   :  { %1102 = vmatpush3.bf16.msra.mxu0 %v1193_v1  ;;  %1185 = vmatpush3.bf16.msra.mxu1 %v1193_v1  ;;  %v1219_v19 = vld [vmem:[%s1568_s0 + $0xc0] sm:$0xff]  }
   0x8   :  { %1103 = vmatprep.subr.bf16.mxu0 %v1194_v4  ;;  %1183 = vmatprep.subr.bf16.mxu1 %v1194_v4 }
   0xb   :  { %1104 = vmatpush3.bf16.msra.mxu0 %v1194_v4  ;;  %1186 = vmatpush3.bf16.msra.mxu1 %v1194_v4 }
   0xe   :  { %1106 = vmatmul.mubr.msk.bf16.vlgmr.msra.gmra.mxu0 %vm263_vm1, %v1196_v5  ;;  %1142 = vmatmul.mubr.msk.bf16.vlgmr.msra.gmra.mxu1 %vm263_vm1, %v1214_v10 }
   0xf   :  { %1109 = vmatprep.mubr.msk.bf16.mxu0 %vm263_vm1, %v1197_v6  ;;  %1145 = vmatprep.mubr.msk.bf16.mxu1 %vm263_vm1, %v1215_v11 }
  0x16   :  { %1110 = vmatmul.mubr.msk.bf16.gmra.mxu0 %vm263_vm1, %v1198_v7  ;;  %1146 = vmatmul.mubr.msk.bf16.gmra.mxu1 %vm263_vm1, %v1216_v14 }
  0x17   :  { %1113 = vmatprep.mubr.msk.bf16.mxu0 %vm263_vm1, %v1199_v8  ;;  %1149 = vmatprep.mubr.msk.bf16.mxu1 %vm263_vm1, %v1217_v15 }
  0x1e   :  { %1114 = vmatmul.mubr.msk.bf16.gmra.mxu0 %vm263_vm1, %v1200_v12 }
  0x1f   :  { %1117 = vmatprep.mubr.msk.bf16.mxu0 %vm263_vm1, %v1201_v13 }
  0x20   :  { %9 = vsyncpa [#allocation3], 0  ;;  %1150 = vmatmul.mubr.msk.bf16.gmra.mxu1 %vm263_vm1, %v1218_v18  ;;  %v1204_v20 = vld [vmem:[%s1568_s0 + $0x48] sm:$0xff]   ;;  %v1205_v21 = vld [vmem:[%s1568_s0 + $0x50] sm:$0xff]   ;;  %vm717_vm2 = vcmask 523264   ;;  %vm860_vm3 = vcmask 1041409  }
  0x21   :  { %1153 = vmatprep.mubr.msk.bf16.mxu1 %vm263_vm1, %v1219_v19  ;;  %v1220_v22 = vld [vmem:[%s1568_s0 + $0xc8] sm:$0xff]   ;;  %v1221_v23 = vld [vmem:[%s1568_s0 + $0xd0] sm:$0xff]   ;;  %v1206_v24 = vld [vmem:[%s1568_s0 + $0x58] sm:$0xff]   ;;  %v1257_v19 = vmov 0.0   ;;  %vm863_vm4 = vcmask 517120   ;;  %vm1258_vm5 = vmmov 0  }
  0x22   :  { %v1207_v25 = vld [vmem:[%s1568_s0 + $0x60] sm:$0xff]   ;;  %v1222_v26 = vld [vmem:[%s1568_s0 + $0xd8] sm:$0xff]   ;;  %v1208_v28 = vld [vmem:[%s1568_s0 + $0x68] sm:$0xff]   ;;  %1169 = vmatprep.subr.bf16.mxu1 %v1257_v19  ;;  %s1259_s12 = smov [#allocation2]  }
  0x23   :  { %v1223_v27 = vld [vmem:[%s1568_s0 + $0xe0] sm:$0xff]   ;;  %v1209_v29 = vld [vmem:[%s1568_s0 + $0x70] sm:$0xff]   ;;  %v1224_v30 = vld [vmem:[%s1568_s0 + $0xe8] sm:$0xff]   ;;  %s978_s13 = sshll.u32 %s1259_s12, 4  ;;  %s979_s13 = int_to_ptr.vmem [resolvable:$true] %s978_s13 }
  0x24   :  { %v1225_v31 = vld [vmem:[%s1568_s0 + $0xf0] sm:$0xff]   ;;  %v1210_v32 = vld [vmem:[%s1568_s0 + $0x78] sm:$0xff]   ;;  %v1211_v33 = vld [vmem:[%s1568_s0 + $0x80] sm:$0xff]   ;;  %s1235_s14 = scalar_lea.vmem %s979_s13, 32  ;;  %p1240_p1 = scmp.lt.s32.totalorder %s979_s13, %s979_s13 }
  0x25   :  { %v1226_v34 = vld [vmem:[%s1568_s0 + $0xf8] sm:$0xff]   ;;  %v1212_v35 = vld [vmem:[%s1568_s0 + $0x88] sm:$0xff]   ;;  %p1236_p0 = scmp.ne.s32.totalorder %s979_s13, %s1235_s14  ;;  %p1241_p2 = scmp.lt.s32.totalorder %s1235_s14, %s1235_s14 }
  0x26   :  { %1118 = vmatmul.mubr.msk.bf16.gmra.mxu0 %vm263_vm1, %v1202_v16  ;;  %v1227_v16 = vld [vmem:[%s1570_s2 + $0x18] sm:$0xff]  }
  0x27   :  { %1121 = vmatprep.mubr.msk.bf16.mxu0 %vm263_vm1, %v1203_v17  ;;  %1170 = vmatpush3.bf16.msra.mxu1 %v1227_v16  ;;  %p1242_p3 = por %p1241_p2, %p1240_p1 }
  0x28   :  { %1154 = vmatmul.mubr.msk.bf16.gmra.mxu1 %vm263_vm1, %v1220_v22  ;;  %1171 = vmatprep.subr.bf16.mxu1 %v1257_v19 }
  0x29   :  { %1157 = vmatprep.mubr.msk.bf16.mxu1 %vm263_vm1, %v1221_v23  ;;  %v1228_v23 = vld [vmem:[%s1570_s2 + $0x10] sm:$0xff]   ;;  %p1243_p4 = pnand %p1242_p3, %p1236_p0 }
  0x2b   :  { %1172 = vmatpush3.bf16.msra.mxu1 %v1228_v23 }
  0x2c   :  { %1173 = vmatprep.subr.bf16.mxu1 %v1257_v19 }
  0x2e   :  { %1122 = vmatmul.mubr.msk.bf16.gmra.mxu0 %vm263_vm1, %v1204_v20 }
  0x2f   :  { %1125 = vmatprep.mubr.msk.bf16.mxu0 %vm263_vm1, %v1205_v21 }
  0x30   :  { %1158 = vmatmul.mubr.msk.bf16.gmra.mxu1 %vm263_vm1, %v1222_v26 }
  0x31   :  { %1161 = vmatprep.mubr.msk.bf16.mxu1 %vm263_vm1, %v1223_v27 }
  0x36   :  { %1126 = vmatmul.mubr.msk.bf16.gmra.mxu0 %vm263_vm1, %v1206_v24 }
  0x37   :  { %1129 = vmatprep.mubr.msk.bf16.mxu0 %vm263_vm1, %v1207_v25 }
  0x38   :  { %1162 = vmatmul.mubr.msk.bf16.gmra.mxu1 %vm263_vm1, %v1224_v30 }
  0x39   :  { %1165 = vmatprep.mubr.msk.bf16.mxu1 %vm263_vm1, %v1225_v31 }
  0x3e   :  { %1130 = vmatmul.mubr.msk.bf16.gmra.mxu0 %vm263_vm1, %v1208_v28 }
  0x3f   :  { %1133 = vmatprep.mubr.msk.bf16.mxu0 %vm263_vm1, %v1209_v29 }
  0x40   :  { %1166 = vmatmul.mubr.msk.bf16.gmra.mxu1 %vm263_vm1, %v1226_v34 }
  0x41   :  { %1177 = vmatprep.mubr.msk.bf16.mxu1 %vm1258_vm5, %v1257_v19 }
  0x46   :  { %1134 = vmatmul.mubr.msk.bf16.gmra.mxu0 %vm263_vm1, %v1210_v32  ;;  %v1229_v32 = vld [vmem:[%s1570_s2 + $0x8] sm:$0xff]  }
  0x47   :  { %1137 = vmatprep.mubr.msk.bf16.mxu0 %vm263_vm1, %v1211_v33  ;;  %1174 = vmatpush3.bf16.msra.mxu1 %v1229_v32 }
  0x48   :  { %1175 = vmatprep.subr.bf16.mxu1 %v1257_v19  ;;  %v1053_v19 = vld [vmem:[%s1571_s3] ss:$0 sm:$0xff] }
  0x4e   :  { %1138 = vmatmul.mubr.msk.bf16.gmra.mxu0 %vm263_vm1, %v1212_v35 }
  0xce   :  { %v1107_v36 = vpop.f32.mrf.mxu0  ;;  %v1429_v56 = vpop.f32.mrf.mxu1 }
  0xcf   :  { %v655_v41 = vmax.f32 %v1107_v36, 0.0 }
  0xd0   :  { %v398_v37 = vpop.f32.mrf.mxu0  ;;  %v1433_v2 = vpop.f32.mrf.mxu1 }
  0xd1   :  { %v653_v39 = vmax.f32 %v398_v37, 0.0  ;;  %v721_v49 = vsel %vm717_vm2, %v655_v41, 0.0 }
  0xd2   :  { %v1108_v38 = vpop.f32.mrf.mxu0  ;;  %v1437_v10 = vpop.f32.mrf.mxu1 }
  0xd3   :  { %v718_v44 = vsel %vm717_vm2, %v653_v39, 0.0  ;;  %v656_v45 = vmax.f32 %v1108_v38, 0.0 }
  0xd4   :  { %v401_v40 = vpop.f32.mrf.mxu0  ;;  %v1445_v22 = vpop.f32.mrf.mxu1 }
  0xd5   :  { %v654_v42 = vmax.f32 %v401_v40, 0.0  ;;  %v723_v53 = vsel %vm717_vm2, %v656_v45, 0.0 }
  0xd6   :  { %v1111_v43 = vpop.f32.mrf.mxu0  ;;  %v1453_v31 = vpop.f32.mrf.mxu1 }
  0xd7   :  { %v719_v46 = vsel %vm717_vm2, %v654_v42, 0.0  ;;  %v659_v57 = vmax.f32 %v1111_v43, 0.0 }
  0xd8   :  { %v720_v47 = vadd.f32 %v719_v46, %v718_v44  ;;  %v414_v48 = vpop.f32.mrf.mxu0  ;;  %v1461_v42 = vpop.f32.mrf.mxu1 }
  0xd9   :  { %v657_v50 = vmax.f32 %v414_v48, 0.0  ;;  %v729_v3 = vsel %vm717_vm2, %v659_v57, 0.0 }
  0xda   :  { %v722_v51 = vadd.f32 %v721_v49, %v720_v47  ;;  %v1112_v52 = vpop.f32.mrf.mxu0 }
  0xdb   :  { %v725_v58 = vsel %vm717_vm2, %v657_v50, 0.0  ;;  %v660_v62 = vmax.f32 %v1112_v52, 0.0  ;;  %v1466_v50 = vpop.f32.mrf.mxu1 }
  0xdc   :  { %v724_v54 = vadd.f32 %v723_v53, %v722_v51  ;;  %v417_v55 = vpop.f32.mrf.mxu0 }
  0xdd   :  { %v658_v59 = vmax.f32 %v417_v55, 0.0  ;;  %v731_v7 = vsel %vm717_vm2, %v660_v62, 0.0 }
  0xde   :  { %v726_v60 = vadd.f32 %v725_v58, %v724_v54  ;;  %v1115_v61 = vpop.f32.mrf.mxu0 }
  0xdf   :  { %v727_v63 = vsel %vm717_vm2, %v658_v59, 0.0  ;;  %v663_v11 = vmax.f32 %v1115_v61, 0.0  ;;  %v1470_v61 = vpop.f32.mrf.mxu1 }
  0xe0   :  { %v728_v0 = vadd.f32 %v727_v63, %v726_v60  ;;  %v430_v1 = vpop.f32.mrf.mxu0 }
  0xe1   :  { %v661_v4 = vmax.f32 %v430_v1, 0.0  ;;  %v737_v24 = vsel %vm717_vm2, %v663_v11, 0.0 }
  0xe2   :  { %v730_v5 = vadd.f32 %v729_v3, %v728_v0  ;;  %v1116_v6 = vpop.f32.mrf.mxu0 }
  0xe3   :  { %v733_v12 = vsel %vm717_vm2, %v661_v4, 0.0  ;;  %v664_v17 = vmax.f32 %v1116_v6, 0.0  ;;  %v1474_v6 = vpop.f32.mrf.mxu1 }
  0xe4   :  { %v732_v8 = vadd.f32 %v731_v7, %v730_v5  ;;  %v433_v9 = vpop.f32.mrf.mxu0 }
  0xe5   :  { %v662_v13 = vmax.f32 %v433_v9, 0.0  ;;  %v739_v28 = vsel %vm717_vm2, %v664_v17, 0.0  ;;  %v1478_v17 = vpop.f32.mrf.mxu1 }
  0xe6   :  { %v734_v14 = vadd.f32 %v733_v12, %v732_v8  ;;  %v1119_v15 = vpop.f32.mrf.mxu0 }
  0xe7   :  { %v735_v18 = vsel %vm717_vm2, %v662_v13, 0.0  ;;  %v667_v33 = vmax.f32 %v1119_v15, 0.0 }
  0xe8   :  { %v736_v20 = vadd.f32 %v735_v18, %v734_v14  ;;  %v446_v21 = vpop.f32.mrf.mxu0 }
  0xe9   :  { %v665_v25 = vmax.f32 %v446_v21, 0.0  ;;  %v745_v43 = vsel %vm717_vm2, %v667_v33, 0.0 }
  0xea   :  { %v738_v26 = vadd.f32 %v737_v24, %v736_v20  ;;  %v1120_v27 = vpop.f32.mrf.mxu0 }
  0xeb   :  { %v741_v34 = vsel %vm717_vm2, %v665_v25, 0.0  ;;  %v668_v38 = vmax.f32 %v1120_v27, 0.0  ;;  %v1482_v27 = vpop.f32.mrf.mxu1 }
  0xec   :  { %v740_v29 = vadd.f32 %v739_v28, %v738_v26  ;;  %v449_v30 = vpop.f32.mrf.mxu0 }
  0xed   :  { %v666_v35 = vmax.f32 %v449_v30, 0.0  ;;  %v747_v47 = vsel %vm717_vm2, %v668_v38, 0.0  ;;  %v1486_v38 = vpop.f32.mrf.mxu1 }
  0xee   :  { %v742_v36 = vadd.f32 %v741_v34, %v740_v29  ;;  %v1123_v37 = vpop.f32.mrf.mxu0 }
  0xef   :  { %v743_v39 = vsel %vm717_vm2, %v666_v35, 0.0  ;;  %v671_v51 = vmax.f32 %v1123_v37, 0.0 }
  0xf0   :  { %v744_v40 = vadd.f32 %v743_v39, %v742_v36  ;;  %v462_v41 = vpop.f32.mrf.mxu0 }
  0xf1   :  { %v669_v44 = vmax.f32 %v462_v41, 0.0  ;;  %v753_v62 = vsel %vm717_vm2, %v671_v51, 0.0 }
  0xf2   :  { %v746_v45 = vadd.f32 %v745_v43, %v744_v40  ;;  %v1124_v46 = vpop.f32.mrf.mxu0 }
  0xf3   :  { %v749_v52 = vsel %vm717_vm2, %v669_v44, 0.0  ;;  %v672_v57 = vmax.f32 %v1124_v46, 0.0 }
  0xf4   :  { %v748_v48 = vadd.f32 %v747_v47, %v746_v45  ;;  %v465_v49 = vpop.f32.mrf.mxu0  ;;  %v1490_v47 = vpop.f32.mrf.mxu1 }
  0xf5   :  { %v670_v53 = vmax.f32 %v465_v49, 0.0  ;;  %v755_v3 = vsel %vm717_vm2, %v672_v57, 0.0 }
  0xf6   :  { %v750_v54 = vadd.f32 %v749_v52, %v748_v48  ;;  %v1127_v55 = vpop.f32.mrf.mxu0 }
  0xf7   :  { %v751_v58 = vsel %vm717_vm2, %v670_v53, 0.0  ;;  %v675_v7 = vmax.f32 %v1127_v55, 0.0 }
  0xf8   :  { %v752_v59 = vadd.f32 %v751_v58, %v750_v54  ;;  %v478_v60 = vpop.f32.mrf.mxu0 }
  0xf9   :  { %v673_v63 = vmax.f32 %v478_v60, 0.0  ;;  %v761_v18 = vsel %vm717_vm2, %v675_v7, 0.0 }
  0xfa   :  { %v754_v0 = vadd.f32 %v753_v62, %v752_v59  ;;  %v1128_v1 = vpop.f32.mrf.mxu0  ;;  %v1494_v59 = vpop.f32.mrf.mxu1 }
  0xfb   :  { %v757_v8 = vsel %vm717_vm2, %v673_v63, 0.0  ;;  %v676_v13 = vmax.f32 %v1128_v1, 0.0 }
  0xfc   :  { %v756_v4 = vadd.f32 %v755_v3, %v754_v0  ;;  %v481_v5 = vpop.f32.mrf.mxu0 }
  0xfd   :  { %v674_v9 = vmax.f32 %v481_v5, 0.0  ;;  %v763_v24 = vsel %vm717_vm2, %v676_v13, 0.0  ;;  %v1500_v5 = vpop.f32.mrf.mxu1 }
  0xfe   :  { %v758_v11 = vadd.f32 %v757_v8, %v756_v4  ;;  %v1131_v12 = vpop.f32.mrf.mxu0 }
  0xff   :  { %v759_v14 = vsel %vm717_vm2, %v674_v9, 0.0  ;;  %v679_v28 = vmax.f32 %v1131_v12, 0.0 }
 0x100   :  { %v760_v15 = vadd.f32 %v759_v14, %v758_v11  ;;  %v494_v16 = vpop.f32.mrf.mxu0  ;;  %v593_v14 = vpop.f32.mrf.mxu1 }
 0x101   :  { %v677_v20 = vmax.f32 %v494_v16, 0.0  ;;  %v769_v39 = vsel %vm717_vm2, %v679_v28, 0.0  ;;  %v689_v16 = vmax.f32 %v1433_v2, 0.0 }
 0x102   :  { %v762_v21 = vadd.f32 %v761_v18, %v760_v15  ;;  %v1132_v23 = vpop.f32.mrf.mxu0 }
 0x103   :  { %v765_v29 = vsel %vm717_vm2, %v677_v20, 0.0  ;;  %v680_v34 = vmax.f32 %v1132_v23, 0.0 }
 0x104   :  { %v764_v25 = vadd.f32 %v763_v24, %v762_v21  ;;  %v497_v26 = vpop.f32.mrf.mxu0  ;;  %v690_v21 = vmax.f32 %v1445_v22, 0.0  ;;  %v1508_v24 = vpop.f32.mrf.mxu1 }
 0x105   :  { %v678_v30 = vmax.f32 %v497_v26, 0.0  ;;  %v771_v44 = vsel %vm717_vm2, %v680_v34, 0.0  ;;  %v794_v26 = vsel %vm717_vm2, %v689_v16, 0.0  ;;  %v693_v34 = vmax.f32 %v1461_v42, 0.0 }
 0x106   :  { %v766_v32 = vadd.f32 %v765_v29, %v764_v25  ;;  %v1135_v33 = vpop.f32.mrf.mxu0  ;;  %v691_v25 = vmax.f32 %v1429_v56, 0.0  ;;  %v692_v29 = vmax.f32 %v1437_v10, 0.0 }
 0x107   :  { %v767_v35 = vsel %vm717_vm2, %v678_v30, 0.0  ;;  %v683_v48 = vmax.f32 %v1135_v33, 0.0  ;;  %v796_v30 = vsel %vm717_vm2, %v690_v21, 0.0  ;;  %v606_v33 = vpop.f32.mrf.mxu1 }
 0x108   :  { %v768_v36 = vadd.f32 %v767_v35, %v766_v32  ;;  %v510_v37 = vpop.f32.mrf.mxu0  ;;  %v798_v2 = vsel %vm717_vm2, %v691_v25, 0.0  ;;  %v800_v22 = vsel %vm717_vm2, %v692_v29, 0.0 }
 0x109   :  { %v681_v40 = vmax.f32 %v510_v37, 0.0  ;;  %v777_v60 = vsel %vm717_vm2, %v683_v48, 0.0  ;;  %v1160_v56 = vpop.f32.mrf.mxu1 }
 0x10a   :  { %v770_v41 = vadd.f32 %v769_v39, %v768_v36  ;;  %v1136_v43 = vpop.f32.mrf.mxu0  ;;  %v694_v36 = vmax.f32 %v1470_v61, 0.0  ;;  %v695_v39 = vmax.f32 %v1453_v31, 0.0 }
 0x10b   :  { %v773_v49 = vsel %vm717_vm2, %v681_v40, 0.0  ;;  %v684_v54 = vmax.f32 %v1136_v43, 0.0  ;;  %v802_v40 = vsel %vm717_vm2, %v693_v34, 0.0 }
 0x10c   :  { %v772_v45 = vadd.f32 %v771_v44, %v770_v41  ;;  %v513_v46 = vpop.f32.mrf.mxu0  ;;  %v696_v41 = vmax.f32 %v1466_v50, 0.0  ;;  %v804_v43 = vsel %vm717_vm2, %v694_v36, 0.0  ;;  %v806_v42 = vsel %vm717_vm2, %v695_v39, 0.0 }
 0x10d   :  { %v682_v51 = vmax.f32 %v513_v46, 0.0  ;;  %v779_v0 = vsel %vm717_vm2, %v684_v54, 0.0  ;;  %v697_v46 = vmax.f32 %v1478_v17, 0.0  ;;  %v700_v54 = vmax.f32 %v1482_v27, 0.0 }
 0x10e   :  { %v774_v52 = vadd.f32 %v773_v49, %v772_v45  ;;  %v1139_v53 = vpop.f32.mrf.mxu0  ;;  %v609_v45 = vpop.f32.mrf.mxu1  ;;  %v808_v61 = vsel %vm717_vm2, %v696_v41, 0.0  ;;  %v698_v49 = vmax.f32 %v1486_v38, 0.0  ;;  %v704_v27 = vmax.f32 %v1500_v5, 0.0 }
 0x10f   :  { %v775_v55 = vsel %vm717_vm2, %v682_v51, 0.0  ;;  %v687_v7 = vmax.f32 %v1139_v53, 0.0  ;;  %v810_v53 = vsel %vm717_vm2, %v697_v46, 0.0  ;;  %v816_v38 = vsel %vm717_vm2, %v700_v54, 0.0 }
 0x110   :  { %v776_v57 = vadd.f32 %v775_v55, %v774_v52  ;;  %v526_v58 = vpop.f32.mrf.mxu0  ;;  %v1163_v31 = vpop.f32.mrf.mxu1  ;;  %v699_v52 = vmax.f32 %v1474_v6, 0.0  ;;  %v812_v55 = vsel %vm717_vm2, %v698_v49, 0.0  ;;  %v703_v6 = vmax.f32 %v1490_v47, 0.0 }
 0x111   :  { %v685_v1 = vmax.f32 %v526_v58, 0.0  ;;  %v790_v15 = vsel %vm717_vm2, %v687_v7, 0.0  ;;  %v707_v47 = vmax.f32 %v1508_v24, 0.0 }
 0x112   :  { %v778_v62 = vadd.f32 %v777_v60, %v776_v57  ;;  %v1140_v63 = vpop.f32.mrf.mxu0  ;;  %v622_v58 = vpop.f32.mrf.mxu1  ;;  %v814_v17 = vsel %vm717_vm2, %v699_v52, 0.0  ;;  %v701_v60 = vmax.f32 %v1494_v59, 0.0  ;;  %v705_v59 = vmax.f32 %v606_v33, 0.0 }
 0x113   :  { %v787_v9 = vsel %vm717_vm2, %v685_v1, 0.0  ;;  %v688_v11 = vmax.f32 %v1140_v63, 0.0  ;;  %v702_v63 = vmax.f32 %v593_v14, 0.0  ;;  %v706_v14 = vmax.f32 %v609_v45, 0.0 }
 0x114   :  { %v1498_v3 = vadd.f32 %v779_v0, %v778_v62  ;;  %v529_v4 = vpop.f32.mrf.mxu0  ;;  %v1164_v1 = vpop.f32.mrf.mxu1  ;;  %v709_v29 = vmax.f32 %v622_v58, 0.0 }
 0x115   :  { %v686_v8 = vmax.f32 %v529_v4, 0.0  ;;  %v792_v20 = vsel %vm717_vm2, %v688_v11, 0.0  ;;  %v818_v4 = vsel %vm717_vm2, %v701_v60, 0.0  ;;  %v828_v5 = vsel %vm717_vm2, %v706_v14, 0.0 }
 0x116   :  { %v625_v11 = vpop.f32.mrf.mxu1  ;;  %v834_v24 = vsel %vm717_vm2, %v709_v29, 0.0  ;;  %v712_v36 = vmax.f32 %v1164_v1, 0.0  ;;  %v781_v41 = vrot.slane %v1498_v3, 4 }
 0x117   :  { %v788_v12 = vsel %vm717_vm2, %v686_v8, 0.0  ;;  %v820_v8 = vsel %vm717_vm2, %v702_v63, 0.0  ;;  %v710_v33 = vmax.f32 %v625_v11, 0.0 }
 0x118   :  { %v789_v13 = vadd.f32 %v788_v12, %v787_v9  ;;  %v822_v12 = vsel %vm717_vm2, %v703_v6, 0.0 }
 0x11a   :  { %v791_v18 = vadd.f32 %v790_v15, %v789_v13  ;;  %v824_v15 = vsel %vm717_vm2, %v704_v27, 0.0 }
 0x11c   :  { %v793_v23 = vadd.f32 %v792_v20, %v791_v18  ;;  %v1167_v18 = vpop.f32.mrf.mxu1  ;;  %v826_v20 = vsel %vm717_vm2, %v705_v59, 0.0 }
 0x11d   :  { %v715_v46 = vmax.f32 %v1167_v18, 0.0 }
 0x11e   :  { %v795_v28 = vadd.f32 %v794_v26, %v793_v23  ;;  %v708_v23 = vmax.f32 %v1160_v56, 0.0  ;;  %v638_v26 = vpop.f32.mrf.mxu1 }
 0x120   :  { %v797_v32 = vadd.f32 %v796_v30, %v795_v28  ;;  %v830_v28 = vsel %vm717_vm2, %v707_v47, 0.0  ;;  %v1168_v34 = vpop.f32.mrf.mxu1 }
 0x122   :  { %v799_v35 = vadd.f32 %v798_v2, %v797_v32  ;;  %v832_v32 = vsel %vm717_vm2, %v708_v23, 0.0  ;;  %v641_v39 = vpop.f32.mrf.mxu1 }
 0x123   :  { %v714_v45 = vmax.f32 %v641_v39, 0.0 }
 0x124   :  { %v801_v37 = vadd.f32 %v800_v22, %v799_v35  ;;  %v711_v35 = vmax.f32 %v1163_v31, 0.0 }
 0x125   :  { %v844_v31 = vsel %vm717_vm2, %v714_v45, 0.0 }
 0x126   :  { %v803_v10 = vadd.f32 %v802_v40, %v801_v37  ;;  %v836_v37 = vsel %vm717_vm2, %v710_v33, 0.0  ;;  %v838_v40 = vsel %vm717_vm2, %v711_v35, 0.0 }
 0x128   :  { %v805_v44 = vadd.f32 %v804_v43, %v803_v10  ;;  %v713_v10 = vmax.f32 %v638_v26, 0.0 }
 0x12a   :  { %v807_v48 = vadd.f32 %v806_v42, %v805_v44  ;;  %v840_v44 = vsel %vm717_vm2, %v712_v36, 0.0 }
 0x12c   :  { %v809_v51 = vadd.f32 %v808_v61, %v807_v48  ;;  %v842_v48 = vsel %vm717_vm2, %v713_v10, 0.0  ;;  %v782_v61 = vadd.f32 %v781_v41, %v1498_v3 }
 0x12e   :  { %v811_v50 = vadd.f32 %v810_v53, %v809_v51  ;;  %v716_v51 = vmax.f32 %v1168_v34, 0.0  ;;  %v846_v53 = vsel %vm717_vm2, %v715_v46, 0.0  ;;  %v783_v54 = vrot.slane %v782_v61, 2 }
 0x130   :  { %v813_v57 = vadd.f32 %v812_v55, %v811_v50  ;;  %v848_v55 = vsel %vm717_vm2, %v716_v51, 0.0 }
 0x132   :  { %v815_v62 = vadd.f32 %v814_v17, %v813_v57  ;;  %v784_v17 = vadd.f32 %v783_v54, %v782_v61 }
 0x134   :  { %v817_v0 = vadd.f32 %v816_v38, %v815_v62  ;;  %v785_v62 = vrot.slane %v784_v17, 1 }
 0x136   :  { %v819_v7 = vadd.f32 %v818_v4, %v817_v0  ;;  %v786_v0 = vadd.f32 %v785_v62, %v784_v17 }
 0x138   :  { %v821_v9 = vadd.f32 %v820_v8, %v819_v7  ;;  %v856_v6 = vmul.f32 %v786_v0, %v786_v0  ;;  %v1230_v8 = vld [vmem:[%s1570_s2] sm:$0xff]  }
 0x139   :  { %1176 = vmatpush3.bf16.msra.mxu1 %v1230_v8 }
 0x13a   :  { %v823_v13 = vadd.f32 %v822_v12, %v821_v9 }
 0x13c   :  { %v825_v16 = vadd.f32 %v824_v15, %v823_v13 }
 0x13e   :  { %v827_v21 = vadd.f32 %v826_v20, %v825_v16 }
 0x140   :  { %v829_v25 = vadd.f32 %v828_v5, %v827_v21 }
 0x142   :  { %v831_v30 = vadd.f32 %v830_v28, %v829_v25 }
 0x144   :  { %v833_v2 = vadd.f32 %v832_v32, %v831_v30 }
 0x146   :  { %v835_v22 = vadd.f32 %v834_v24, %v833_v2 }
 0x148   :  { %v837_v56 = vadd.f32 %v836_v37, %v835_v22 }
 0x14a   :  { %v839_v43 = vadd.f32 %v838_v40, %v837_v56 }
 0x14c   :  { %v841_v42 = vadd.f32 %v840_v44, %v839_v43 }
 0x14e   :  { %v843_v49 = vadd.f32 %v842_v48, %v841_v42 }
 0x150   :  { %v845_v52 = vadd.f32 %v844_v31, %v843_v49 }
 0x152   :  { %v847_v50 = vadd.f32 %v846_v53, %v845_v52 }
 0x154   :  { %v849_v57 = vadd.f32 %v848_v55, %v847_v50 }
 0x156   :  { %v850_v58 = vrot.slane %v849_v57, 4 }
 0x158   :  { %v851_v60 = vadd.f32 %v850_v58, %v849_v57 }
 0x15a   :  { %v852_v38 = vrot.slane %v851_v60, 2 }
 0x15c   :  { %v853_v63 = vadd.f32 %v852_v38, %v851_v60 }
 0x15e   :  { %v854_v3 = vrot.slane %v853_v63, 1 }
 0x160   :  { %v855_v1 = vadd.f32 %v854_v3, %v853_v63 }
 0x162   :  { %v857_v4 = vmul.f32 %v855_v1, %v855_v1 }
 0x164   :  { %v861_v7 = vsel %vm860_vm3, %v857_v4, %v856_v6 }
 0x165   :  { %v864_v27 = vsel %vm863_vm4, %v861_v7, 0.0 }
 0x166   :  { %865 = vadd.xlane.f32.xlu0 %v864_v27 }
 0x1ef   :  { %v866_v9 = vpop.xlane.xlu0 %865 }
 0x1f0   :  { %1231 = vrsqrt.f32 %v866_v9 }
 0x1fd   :  { %v1232_v11 = vpop.eup %1231 }
 0x1fe   :  { %v869_v12 = vrot.slane %v1232_v11, 1  ;;  %v872_v59 = vmul.f32 %v1232_v11, %v786_v0 }
 0x200   :  { %v873_v13 = vmul.f32 %v869_v12, %v855_v1  ;;  %v874_v15 = vpack.c.bf16 %v872_v59, %v872_v59 }
 0x202   :  { %v875_v14 = vpack.c.bf16 %v873_v13, %v873_v13  ;;  %v893_v18 = vunpack.c.l.b16 %v874_v15 }
 0x204   :  { %v894_v16 = vunpack.c.l.b16 %v875_v14 }
 0x206   :  { %v895_v47 = vrot.slane %v894_v16, 7 }
 0x208   :  { %v896_v20 = vsel %vm860_vm3, %v895_v47, %v893_v18 }
 0x209   :  { %v897_v21 = vpack.c.b16 %v896_v20, %v896_v20 }
 0x20b   :  { %1178 = vmatmul.mubr.msk.bf16.vlgmr.msra.gmra.mxu1 %vm717_vm2, %v897_v21 }
 0x2cb   :  { %v959_v23 = vpop.f32.mrf.mxu1 }
 0x2cc   :  { %v960_v5 = vadd.f32 %v1053_v19, %v959_v23 }
 0x2cd   :  { %v1179_v25 = vpop.f32.mrf.mxu1 }
 0x2ce   :  { %v965_v26 = vmul.f32 %v960_v5, %v960_v5 }
 0x2cf   :  { %v962_v28 = vpop.f32.mrf.mxu1 }
 0x2d0   :  { %v966_v29 = vsel %vm360_vm0, %v965_v26, 0.0 }
 0x2d1   :  { %967 = vadd.xlane.f32.xlu0 %v966_v29  ;;  %v1180_v30 = vpop.f32.mrf.mxu1 }
 0x35a   :  { %v968_v32 = vpop.xlane.xlu0 %967 }
 0x35b   :  { %1233 = vrsqrt.f32 %v968_v32 }
 0x368   :  { %v1234_v33 = vpop.eup %1233 }
 0x369   :  { %v970_v2 = vmul.f32 %v1234_v33, %v960_v5 }
 0x36b   :  { %971 = vst [vmem:[#allocation2] sm:$0x3] %v970_v2 }
 0x36c   :  { %1246 = shalt.err (!%p1243_p4)
}
 0x36d   :  { %981 = dma.vmem_to_hbm [thread:$0]  %s979_s13, 32, %s1572_s4, [#allocation3]  }
 0x36e   :  { %1255 = dma.done.wait [#allocation3], 32  }
 0x36f   :  { %1256 = vsyncadd [#allocation3], 4294967264 }
 0x370   :  { %985 = vsyncpa [#allocation3], 1 }

</bundles_post_ra>
